<compile_context>
chip_gen: v5e
topology: v5e:2x2
jax: 0.10.0
libtpu: 0.0.40
codegen_flags: <defaults>
</compile_context>

<pallas_src>
import functools

import jax
import jax.numpy as jnp
from jax.experimental import pallas as pl
from jax.experimental.pallas import tpu as pltpu

BN_EPS = 1e-5


@functools.lru_cache(maxsize=None)
def _dx0_in_low_bits() -> bool:
    """True iff lax.bitcast_convert_type(u32 -> 2 x 16-bit) puts the LOW 16 bits at index 0.

    Used so the in-kernel u32 phase packing and the wrapper-side unpacking agree on which
    16-bit half of the packed word holds the dx=0 output column (endianness-robust).
    """
    with jax.ensure_compile_time_eval():
        pair = jax.lax.bitcast_convert_type(jnp.uint32(0x00020001), jnp.uint16)
        return bool(int(pair[0]) == 1)


def _x_moments_kernel(x_ref, sx_ref, gram_ref):
    """Pass 1: per-tile input moments feeding the BatchNorm statistics.

    x_ref:    (Cin, tile_m) f32 input pixels (lane-dense)
    sx_ref:   (Cin, 1)      f32 per-tile sum over pixels (of the bf16-rounded values)
    gram_ref: (Cin, Cin)    f32 per-tile Gram x @ x^T (contraction over tile_m, on the MXU)
    """
    xb = x_ref[...].astype(jnp.bfloat16)  # same values pass 2 multiplies with
    sx_ref[...] = jnp.sum(xb.astype(jnp.float32), axis=1, keepdims=True)
    gram_ref[...] = jax.lax.dot_general(
        xb, xb, dimension_numbers=(((1,), (1,)), ((), ())),
        preferred_element_type=jnp.float32)


def _conv_bn_pack_kernel(w_ref, scale_ref, shift_ref, x_ref, out_ref, *, dx0_low):
    """Pass 2: fused conv GEMM + BN affine + in-lane dx phase packing.

    w_ref:     (4*Cout, Cin)    bf16, rows ordered (dx, dy, c)
    scale_ref: (4*Cout, 1)      f32 per-row BN scale (depends on c only)
    shift_ref: (4*Cout, 1)      f32 per-row BN shift
    x_ref:     (Cin, tile_m)    f32 input pixels (lane-dense)
    out_ref:   (2*Cout, tile_m) u32, rows ordered (dy, c); each u32 lane packs the bf16
               outputs of the two dx phases of one input pixel.
    """
    xb = x_ref[...].astype(jnp.bfloat16)
    y = jnp.dot(w_ref[...], xb, preferred_element_type=jnp.float32)  # (4*Cout, tile_m)
    y = y * scale_ref[...] + shift_ref[...]
    half = y.shape[0] // 2
    # bf16-round, then grab the bf16 bit pattern (it sits in the top 16 bits of the f32
    # encoding; the low 16 bits are zero after the round-trip).
    b0 = pltpu.bitcast(y[:half].astype(jnp.bfloat16).astype(jnp.float32), jnp.uint32)
    b1 = pltpu.bitcast(y[half:].astype(jnp.bfloat16).astype(jnp.float32), jnp.uint32)
    if dx0_low:
        out_ref[...] = (b0 >> 16) | b1      # dx=0 in the low half, dx=1 in the high half
    else:
        out_ref[...] = (b1 >> 16) | b0      # dx=0 in the high half, dx=1 in the low half


def _pick_tile_m(hw, n_images, max_tile_m):
    """Largest multiple-of-128 divisor of hw that is <= max_tile_m (else full hw), shrunk
    by powers of two so the (N, m-tiles) grid has enough steps for megacore + pipelining
    while keeping tiles lane-rich."""
    if hw % 128 != 0:
        return hw  # full image per step; lane padding tolerated
    t = max(128, max_tile_m - max_tile_m % 128)
    t = min(t, hw)
    while hw % t != 0:
        t -= 128
    # Aim for >= 4 grid steps while keeping >= 512 lanes per tile ...
    while n_images * (hw // t) < 4 and t % 256 == 0 and t // 2 >= 512:
        t //= 2
    # ... but always get >= 2 steps if the shape allows (megacore split needs >= 2).
    while n_images * (hw // t) < 2 and t % 256 == 0 and t // 2 >= 128:
        t //= 2
    return t


def transposed_conv2d_forward(x, weight, bias, gamma, beta, *, stride=2,
                              max_tile_m=16384, out_dtype=jnp.bfloat16):
    """Forward of ConvTranspose2d(Cin, Cout, K, stride=2) + BatchNorm2d (training mode).

    x: (N, Cin, H, W) f32.  weight: (Cin, Cout, K, K) -- PyTorch ConvTranspose2d layout.
    Returns (N, Cout, 2H, 2W) in `out_dtype` (bf16 by default per perf review; all heavy
    HBM traffic is bf16/u32 regardless).
    """
    del bias  # exactly cancelled by training-mode BatchNorm mean subtraction
    n, cin, h, w_sp = x.shape
    cin_w, cout, kh, kw = weight.shape
    assert cin == cin_w and kh == kw
    k = kh
    # TODO(synk): general kernel_size (phases with >1 tap + edge handling) not implemented;
    # the module is used as a 2x upsampler with kernel_size=2, stride=2.
    assert k == 2 and stride == 2, "fast path requires kernel_size == stride == 2"

    hw = h * w_sp
    hout, wout = 2 * h, 2 * w_sp
    x3 = x.reshape(n, cin, hw)  # free view of NCHW; no wrapper-side transpose copy

    # Weight rows ordered (dx, dy, c): row (dx*2 + dy)*Cout + c  <-  weight[i, c, dy, dx].
    w_all = (jnp.transpose(weight, (3, 2, 1, 0))
             .reshape(k * k * cout, cin).astype(jnp.bfloat16))

    tile_m = _pick_tile_m(hw, n, max_tile_m)
    num_tiles = hw // tile_m

    cparams = pltpu.CompilerParams(
        dimension_semantics=("parallel", "parallel"),  # megacore split on v7x
        vmem_limit_bytes=32 * 1024 * 1024,
    )

    # ---- pass 1: x-only moments (sum and Gram) per (image, m-tile) ----
    sx_parts, gram_parts = pl.pallas_call(
        _x_moments_kernel,
        grid=(n, num_tiles),
        in_specs=[pl.BlockSpec((None, cin, tile_m), lambda b, i: (b, 0, i))],
        out_specs=(
            pl.BlockSpec((None, None, cin, 1), lambda b, i: (b, i, 0, 0)),
            pl.BlockSpec((None, None, cin, cin), lambda b, i: (b, i, 0, 0)),
        ),
        out_shape=(
            jax.ShapeDtypeStruct((n, num_tiles, cin, 1), jnp.float32),
            jax.ShapeDtypeStruct((n, num_tiles, cin, cin), jnp.float32),
        ),
        compiler_params=cparams,
    )(x3)

    # ---- tiny glue: fold x-moments into per-channel BN scale & shift ----
    sx = sx_parts.sum(axis=(0, 1))[:, 0]                      # (Cin,)
    gram = gram_parts.sum(axis=(0, 1))                        # (Cin, Cin)
    wf = w_all.astype(jnp.float32).reshape(k * k, cout, cin)  # (phase, c, i), bf16-rounded
    count = jnp.float32(n * hout * wout)                      # == 4 * N * H * W
    s1 = jnp.einsum("pci,i->c", wf, sx)                       # sum over phases & pixels of y
    s2 = jnp.einsum("pci,ij,pcj->c", wf, gram, wf)            # sum of y^2
    mean = s1 / count
    # NOTE: one-pass E[y^2] - E[y]^2 in f32; fine here, can lose precision if |mean| >> std.
    var = jnp.maximum(s2 / count - mean * mean, 0.0)
    scale = gamma.astype(jnp.float32) * jax.lax.rsqrt(var + BN_EPS)
    shift = beta.astype(jnp.float32) - mean * scale
    scale_rows = jnp.tile(scale, k * k).reshape(k * k * cout, 1)
    shift_rows = jnp.tile(shift, k * k).reshape(k * k * cout, 1)

    # ---- pass 2: fused conv GEMM + BN affine + in-kernel dx phase packing ----
    out_u32 = pl.pallas_call(
        functools.partial(_conv_bn_pack_kernel, dx0_low=_dx0_in_low_bits()),
        grid=(n, num_tiles),
        in_specs=[
            pl.BlockSpec((k * k * cout, cin), lambda b, i: (0, 0)),   # weights (resident)
            pl.BlockSpec((k * k * cout, 1), lambda b, i: (0, 0)),     # BN scale rows
            pl.BlockSpec((k * k * cout, 1), lambda b, i: (0, 0)),     # BN shift rows
            pl.BlockSpec((None, cin, tile_m), lambda b, i: (b, 0, i)),
        ],
        out_specs=pl.BlockSpec((None, 2 * cout, tile_m), lambda b, i: (b, 0, i)),
        out_shape=jax.ShapeDtypeStruct((n, 2 * cout, hw), jnp.uint32),
        compiler_params=cparams,
    )(w_all, scale_rows, shift_rows, x3)

    # ---- epilogue: free bitcast unpack of the dx pairs + ONE transpose whose contiguous
    #      minor axis is (ix, dx) = 2*W elements, then merge (iy, dy) and (ix, dx) ----
    o = out_u32.reshape(n, 2, cout, h, w_sp)           # (n, dy, c, iy, ix)   [u32 packed dx]
    o = jax.lax.bitcast_convert_type(o, jnp.bfloat16)  # (n, dy, c, iy, ix, dx)
    o = jnp.transpose(o, (0, 2, 3, 1, 4, 5))           # (n, c, iy, dy, ix, dx)
    out = o.reshape(n, cout, hout, wout)
    if out.dtype != out_dtype:
        out = out.astype(out_dtype)
    return out


def _reference_forward(x, weight, bias, gamma, beta, *, stride=2):
    """Pure-JAX/XLA reference for the same semantics (ConvTranspose2d + train-mode BN)."""
    cin, cout, k, _ = weight.shape
    # ConvTranspose == conv over lhs-dilated input with flipped, transposed kernel.
    w_conv = jnp.transpose(weight[:, :, ::-1, ::-1], (1, 0, 2, 3))  # (Cout, Cin, K, K)
    y = jax.lax.conv_general_dilated(
        x.astype(jnp.float32),
        w_conv.astype(jnp.float32),
        window_strides=(1, 1),
        padding=[(k - 1, k - 1), (k - 1, k - 1)],
        lhs_dilation=(stride, stride),
        dimension_numbers=("NCHW", "OIHW", "NCHW"),
    )
    y = y + bias.reshape(1, -1, 1, 1)
    mean = y.mean(axis=(0, 2, 3), keepdims=True)
    var = ((y - mean) ** 2).mean(axis=(0, 2, 3), keepdims=True)
    return (y - mean) * jax.lax.rsqrt(var + BN_EPS) * gamma.reshape(
        1, -1, 1, 1
    ) + beta.reshape(1, -1, 1, 1)


if __name__ == "__main__":
    in_ch, out_ch, kernel_size = 4, 8, 2
    N, H, W = 2, 16, 16  # output spatial = (H-1)*2 + K = 32

    key = jax.random.PRNGKey(0)
    kx, kw, kb, kg, kbt = jax.random.split(key, 5)

    x = jax.random.normal(kx, (N, in_ch, H, W), dtype=jnp.float32)
    # ConvTranspose2d weight layout: (in_ch, out_ch, K, K)
    weight = jax.random.normal(kw, (in_ch, out_ch, kernel_size, kernel_size),
                               dtype=jnp.float32) * 0.2
    bias = jax.random.normal(kb, (out_ch,), dtype=jnp.float32) * 0.1
    gamma = 1.0 + 0.1 * jax.random.normal(kg, (out_ch,), dtype=jnp.float32)
    beta = 0.1 * jax.random.normal(kbt, (out_ch,), dtype=jnp.float32)

    ref = jax.block_until_ready(_reference_forward(x, weight, bias, gamma, beta))

    # Default tiling (single tile per image, N*1 = 2 grid steps), bf16 output.
    out = jax.block_until_ready(
        transposed_conv2d_forward(x, weight, bias, gamma, beta))
    assert out.shape == (N, out_ch, (H - 1) * 2 + kernel_size,
                         (W - 1) * 2 + kernel_size)
    assert jnp.allclose(out.astype(jnp.float32), ref, atol=2e-2, rtol=2e-2), \
        "mismatch vs XLA reference"

    # Force multiple M tiles per image (exercises tiled stat accumulation) + f32 output.
    out_tiled = jax.block_until_ready(
        transposed_conv2d_forward(x, weight, bias, gamma, beta,
                                  max_tile_m=128, out_dtype=jnp.float32))
    assert jnp.allclose(out_tiled, ref, atol=2e-2, rtol=2e-2), \
        "mismatch (multi-tile) vs XLA reference"

    print("KERNEL_OK")
</pallas_src>

<mosaic_0001>
module attributes {stable_mosaic.version = 11 : i64} {
  func.func @_x_moments_kernel(%arg0: i32, %arg1: i32, %arg2: memref<1x4x256xf32, #tpu.memory_space<vmem>>, %arg3: memref<1x1x4x1xf32, #tpu.memory_space<vmem>>, %arg4: memref<1x1x4x4xf32, #tpu.memory_space<vmem>>) attributes {dimension_semantics = [#tpu.dimension_semantics<parallel>, #tpu.dimension_semantics<parallel>], iteration_bounds = array<i64: 2, 1>, scalar_prefetch = 0 : i64, scratch_operands = 0 : i64, tpu.core_type = #tpu.core_type<tc>, window_params = [{transform_indices = @transform_0, window_bounds = array<i64: 1, 4, 256>}, {transform_indices = @transform_1, window_bounds = array<i64: 1, 1, 4, 1>}, {transform_indices = @transform_2, window_bounds = array<i64: 1, 1, 4, 4>}]} {
    %c0 = arith.constant 0 : index
    %c0_0 = arith.constant 0 : index
    %c0_1 = arith.constant 0 : index
    %0 = vector.load %arg2[%c0, %c0_0, %c0_1] : memref<1x4x256xf32, #tpu.memory_space<vmem>>, vector<1x4x256xf32>
    %1 = vector.shape_cast %0 : vector<1x4x256xf32> to vector<4x256xf32>
    %2 = arith.truncf %1 : vector<4x256xf32> to vector<4x256xbf16>
    %3 = arith.extf %2 : vector<4x256xbf16> to vector<4x256xf32>
    %cst = arith.constant dense<0.000000e+00> : vector<4xf32>
    %4 = vector.multi_reduction <add>, %3, %cst [1] : vector<4x256xf32> to vector<4xf32>
    %5 = vector.shape_cast %4 : vector<4xf32> to vector<4x1xf32>
    %c0_2 = arith.constant 0 : index
    %c0_3 = arith.constant 0 : index
    %c0_4 = arith.constant 0 : index
    %c0_5 = arith.constant 0 : index
    %6 = vector.load %arg3[%c0_2, %c0_3, %c0_4, %c0_5] : memref<1x1x4x1xf32, #tpu.memory_space<vmem>>, vector<1x1x4x1xf32>
    %7 = vector.shape_cast %6 : vector<1x1x4x1xf32> to vector<4x1xf32>
    %8 = vector.shape_cast %5 : vector<4x1xf32> to vector<1x1x4x1xf32>
    tpu.vector_store %arg3[%c0_2, %c0_3, %c0_4, %c0_5], %8 {strides = array<i32>} : memref<1x1x4x1xf32, #tpu.memory_space<vmem>>, vector<1x1x4x1xf32>,
    %cst_6 = arith.constant dense<0.000000e+00> : vector<4x4xf32>
    %9 = tpu.matmul %2, %2, %cst_6 {dimension_numbers = #tpu.dot_dimension_numbers<[1], [1], [0], [0], [0, 0, 1, 0], [], []>} : vector<4x256xbf16>, vector<4x256xbf16>, vector<4x4xf32> -> vector<4x4xf32>
    %c0_7 = arith.constant 0 : index
    %c0_8 = arith.constant 0 : index
    %c0_9 = arith.constant 0 : index
    %c0_10 = arith.constant 0 : index
    %10 = vector.load %arg4[%c0_7, %c0_8, %c0_9, %c0_10] : memref<1x1x4x4xf32, #tpu.memory_space<vmem>>, vector<1x1x4x4xf32>
    %11 = vector.shape_cast %10 : vector<1x1x4x4xf32> to vector<4x4xf32>
    %12 = vector.shape_cast %9 : vector<4x4xf32> to vector<1x1x4x4xf32>
    tpu.vector_store %arg4[%c0_7, %c0_8, %c0_9, %c0_10], %12 {strides = array<i32>} : memref<1x1x4x4xf32, #tpu.memory_space<vmem>>, vector<1x1x4x4xf32>,
    return
  }
  func.func @transform_0(%arg0: i32, %arg1: i32) -> (i32, i32, i32) {
    %c0_i32 = arith.constant 0 : i32
    %c0_i32_0 = arith.constant 0 : i32
    return %arg0, %c0_i32, %arg1 : i32, i32, i32
  }
  func.func @transform_1(%arg0: i32, %arg1: i32) -> (i32, i32, i32, i32) {
    %c0_i32 = arith.constant 0 : i32
    %c0_i32_0 = arith.constant 0 : i32
    %c0_i32_1 = arith.constant 0 : i32
    return %arg0, %arg1, %c0_i32, %c0_i32_0 : i32, i32, i32, i32
  }
  func.func @transform_2(%arg0: i32, %arg1: i32) -> (i32, i32, i32, i32) {
    %c0_i32 = arith.constant 0 : i32
    %c0_i32_0 = arith.constant 0 : i32
    %c0_i32_1 = arith.constant 0 : i32
    return %arg0, %arg1, %c0_i32, %c0_i32_0 : i32, i32, i32, i32
  }
}

</mosaic_0001>

<bundles_post_ra>
// kernel: tpu_custom_call.1
= control target key start
LH: loop header
LB: loop body
LE: loop exit
PB: predicated region body
PF: predicated region fallthrough
CT: control target
= control target key end

     0   :  { %8 = vsyncpa [#allocation3], 0  ;;  %s721_s0 = inlined_call_operand.hbm [shape: f32[2,4,256], index: 0, kind: input, shape index: {}]   ;;  %s722_s1 = inlined_call_operand.vmem [shape: f32[2,1,4,1], index: 1, kind: output, shape index: {0}]   ;;  %s723_s2 = inlined_call_operand.hbm [shape: f32[2,1,4,4], index: 2, kind: output, shape index: {1}]  }
   0x1   :  { %10 = vsyncpa [#allocation3 + $0x1], 0 }
   0x2   :  { %11 = vsyncpa [#allocation4], 0 }
   0x3   :  { %13 = vsyncpa [#allocation4 + $0x1], 0  ;;  %s595_s9 = smov 0   ;;  %s597_s10 = smov 0  }
   0x4   :  { %s599_s11 = smov 0   ;;  %s601_s12 = smov 0  }
   0x5   :  { %s603_s13 = smov 0   ;;  %s605_s14 = smov 0  }
   0x6 LB: > { %s388_s15 = sadd.s32 4294967295, %s578_s14   ;;  %s389_s16 = sadd.s32 4294967294, %s578_s14   ;;  %s578_s14 = sphi %s605_s14, %s19_s14   ;;  %s574_s13 = sphi %s603_s13, %s732_s13   ;;  %s570_s12 = sphi %s601_s12, %s731_s12   ;;  %s566_s11 = sphi %s599_s11, %s730_s11   ;;  %s562_s10 = sphi %s597_s10, %s729_s10   ;;  %s558_s9 = sphi %s595_s9, %s728_s9  }
   0x7   : > { %s31_s17 = sadd.s32 1, %s574_s13  ;;  %s40_s18 = sadd.s32 1, %s566_s11 }
   0x8   : > { %p33_p0 = scmp.ge.s32.totalorder %s31_s17, 2  ;;  %p47_p1 = scmp.ne.s32.totalorder %s566_s11, %s562_s10 }
   0x9   : > { %p48_p2 = scmp.eq.s32.totalorder %s578_s14, 0  ;;  %p53_p3 = scmp.ne.s32.totalorder %s562_s10, %s558_s9 }
   0xa   : > { %s734_s17 = smov (%p33_p0, %s31_s17), 0  ;;  %p54_p5 = scmp.eq.s32.totalorder %s388_s15, 0 }
   0xb   : > { %p636_p4 = por %p48_p2, %p47_p1  ;;  %s35_s20 = ssub.s32 %s574_s13, %s734_s17 }
   0xc   : > { %p107_p6 = scmp.eq.s32.totalorder %s388_s15, 1  ;;  %p38_p7 = scmp.eq.s32.totalorder %s35_s20, 0 }
   0xd   : > { %p642_p8 = por %p54_p5, %p53_p3  ;;  %p113_p10 = scmp.eq.s32.totalorder %s389_s16, 1 }
   0xe   : > { %p646_p9 = por %p107_p6, %p47_p1  ;;  %p391_p12 = scmp.ge.s32.totalorder %s578_s14, 2 }
   0xf   : > { %s651_s23 = scalar_select %p38_p7, %s566_s11, %s40_s18  }
  0x10   : > { %p653_p11 = por %p113_p10, %p53_p3  ;;  %p416_p13 = scmp.lt.s32.totalorder %s578_s14, 2 }
  0x11   : > { %s133_s25 = sand.u32 1, %s566_s11   ;;  %s403_s27 = sshll.u32 %s574_s13, 3 }
  0x12   : > { %s392_s26 = sshll.u32 %s133_s25, 3  ;;  %s144_s30 = scalar_lea.hbm %s721_s0, %s403_s27 }
  0x13   : > { %s137_s3 = scalar_lea.vmem [#allocation2], %s392_s26  ;;  %s146_s5 = sshll.u32 %s144_s30, 4  ;;  %s147_s5 = int_to_ptr.hbm [resolvable:$true] %s146_s5 }
  0x14   : > { %s148_s4 = sshll.u32 %s137_s3, 4  ;;  %p409_p0 = pnand %p416_p13, %p636_p4  ;;  %s149_s4 = int_to_ptr.vmem [resolvable:$true] %s148_s4 }
  0x15   : > { %p395_p1 = scmp.ge.s32.totalorder %s578_s14, 1  ;;  %p153_p2 = scmp.lt.s32.totalorder %s578_s14, 3 }
  0x16   : > { %s134_s6 = scalar_lea.sflag [#allocation3], %s133_s25 }
  0x17   : > { %411 = dma.hbm_to_vmem [thread:$0]  (!%p409_p0), %s147_s5, 128, %s149_s4, %s134_s6  }
  0x18   : > { %p154_p3 = pnand %p395_p1, %p153_p2 }
  0x19   : > { %s669_s7 = sand.u32 (!%p154_p3), 1, %s562_s10  }
  0x1a   : > { %157 = sbr.rel (%p154_p3) target bundleno = 184 (0xb8), region = 24  ;;  %s396_s8 = sshll.u32 (!%p154_p3), %s669_s7, 3 }
  0x1b   : > { %s160_s15 = scalar_lea.sflag (!%p154_p3), [#allocation3], %s669_s7  ;;  %s163_s16 = scalar_lea.vmem (!%p154_p3), [#allocation2], %s396_s8 }
  0x1f   : > { %549 = dma.done.wait (%p642_p8), %s160_s15, 128  }
  0x20   : > { %551 = vsyncadd (%p642_p8), %s160_s15, 4294967168  ;;  %v201_v0 = vld [vmem:[%s163_s16] sm:$0xff]  ;;  %vm212_vm0 = vcmask 1043456   ;;  %p193_p4 = scmp.lt.s32.totalorder %s570_s12, 1  ;;  %vm218_vm1 = vcmask 3072   ;;  %s400_s26 = sshll.u32 %s570_s12, 2 }
  0x21   : > { %203 = vst [vmem:[#allocation1] ss:$2 sm:$0xff] %v201_v0  ;;  %s397_s27 = sshll.u32 %s669_s7, 2  ;;  %s270_s30 = scalar_lea.hbm %s723_s2, %s400_s26  ;;  %vm246_vm2 = vcmask 27648  }
  0x22   : > { %s194_s18 = scalar_select %p193_p4, %s570_s12, 1 }
  0x23   : > { %s191_s3 = scalar_lea.vmem [#allocation5], %s397_s27  ;;  %s274_s5 = sshll.u32 %s270_s30, 4  ;;  %s275_s5 = int_to_ptr.hbm [resolvable:$true] %s274_s5 }
  0x24   : > { %s398_s19 = sshll.u32 %s194_s18, 2  ;;  %s272_s4 = sshll.u32 %s191_s3, 4  ;;  %s273_s4 = int_to_ptr.vmem [resolvable:$true] %s272_s4 }
  0x25   : > { %s199_s25 = scalar_lea.vmem %s722_s1, %s398_s19  ;;  %s256_s6 = scalar_lea.sflag [#allocation4], %s669_s7 }
  0x26   : > { %s510_s8 = sshra.s32 %s275_s5, 4  ;;  %s516_s18 = scalar_lea.hbm %s723_s2, 8  ;;  %s511_s8 = int_to_ptr.hbm [resolvable:$true] %s510_s8 }
  0x27   : > { %s512_s12 = scalar_lea.hbm %s511_s8, 4  ;;  %p517_p8 = scmp.lt.s32.totalorder %s511_s8, %s723_s2 }
  0x28   : > { %v204_v1 = vld.sshfl [vmem:[#allocation1] sm:$0xff pattern:$0x75316420]  ;;  %v205_v2 = vld.sshfl [vmem:[#allocation1 + $0x8] sm:$0xff pattern:$0x75316420]  ;;  %p513_p5 = scmp.ne.s32.totalorder %s511_s8, %s512_s12  ;;  %p518_p10 = scmp.lt.s32.totalorder %s516_s18, %s512_s12 }
  0x29   : > { %v208_v3 = vpack.c.bf16 %v204_v1, %v204_v1  ;;  %v209_v4 = vpack.c.bf16 %v205_v2, %v205_v2 }
  0x2a   : > { %p514_p6 = pnand %p513_p5, %p646_p9  ;;  %p519_p13 = por %p518_p10, %p517_p8 }
  0x2b   : > { %227 = vmatpush.bf16.xpose.msra.mxu0 %v208_v3  ;;  %240 = vmatpush.bf16.xpose.msra.mxu1 %v209_v4  ;;  %v210_v5 = vunpack.c.l.bf16 %v208_v3  ;;  %v211_v6 = vunpack.c.l.bf16 %v209_v4 }
  0x2c   : > { %p515_p7 = pneg %p514_p6 }
  0x2d   : > { %v213_v7 = vsel %vm212_vm0, %v210_v5, 0.0  ;;  %v214_v8 = vsel %vm212_vm0, %v211_v6, 0.0 }
  0x2e   : > { %v215_v9 = vadd.f32 %v214_v8, %v213_v7  ;;  %p520_p0 = pnand %p519_p13, %p515_p7 }
  0x30   : > { %216 = vadd.xlane.f32.xlu0 %v215_v9 }
  0x32   : > { %228 = vmatmul.bf16.vlgmr.msra.gmra.mxu0 %v208_v3  ;;  %241 = vmatmul.bf16.vlgmr.msra.gmra.mxu1 %v209_v4 }
  0xa3   : > { %v217_v10 = vpop.xlane.xlu0 %216 }
  0xa4   : > { %219 = vst.msk [vmem:[%s199_s25] sm:$0xf] %vm218_vm1, %v217_v10 }
  0xaf   : > { %v229_v11 = vpop.f32.mrf.mxu0  ;;  %v242_v12 = vpop.f32.mrf.mxu1 }
  0xb0   : > { %v243_v13 = vadd.f32 %v242_v12, %v229_v11 }
  0xb2   : > { %247 = vst.msk [vmem:[%s191_s3] sm:$0xf] %vm246_vm2, %v243_v13 }
  0xb3   : > { %523 = shalt.err (!%p520_p0)
}
  0xb4   : > { %406 = dma.vmem_to_hbm [thread:$0]  (%p646_p9), %s273_s4, 64, %s275_s5, %s256_s6  }
  0xb7   : > { %v231_v14 = vpop.f32.mrf.mxu0  ;;  %v244_v15 = vpop.f32.mrf.mxu1 }
  0xb8 PF: > { %s296_s7 = sand.u32 1, %s558_s9   ;;  %p413_p1 = pnand %p391_p12, %p653_p11 }
  0xb9   : > { %s297_s21 = scalar_lea.sflag [#allocation4], %s296_s7 }
  0xba   : > { %p414_p2 = pneg %p413_p1 }
  0xbc   : > { %553 = dma.done.wait (%p414_p2), %s297_s21, 64  }
  0xbd   : > { %555 = vsyncadd (%p414_p2), %s297_s21, 4294967232  ;;  %s19_s14 = sadd.s32 1, %s578_s14   ;;  %s728_s9 = smov %s562_s10 }
  0xbe   : > { %p16_p3 = scmp.ge.s32.totalorder %s19_s14, 4   ;;  %s729_s10 = smov %s566_s11 }
  0xbf   : > { %s730_s11 = smov %s651_s23  ;;  %s731_s12 = smov %s574_s13 }
  0xc0   : > { %s732_s13 = smov %s734_s17  ;;  %18 = sbr.rel (!%p16_p3) target bundleno = 6 (0x6), region = 81 }
  0xc5   :  { %303 = vsyncpa [#allocation3], 1 }
  0xc6   :  { %305 = vsyncpa [#allocation3 + $0x1], 1 }
  0xc7   :  { %306 = vsyncpa [#allocation4], 1 }
  0xc8   :  { %308 = vsyncpa [#allocation4 + $0x1], 1 }

</bundles_post_ra>
